<compile_context>
chip_gen: v7x
topology: tpu7x:2x2x1
jax: 0.10.0
libtpu: 0.0.40
codegen_flags: <defaults>
</compile_context>

<pallas_src>
import math
import random

import jax
import jax.numpy as jnp
from jax.experimental import pallas as pl
from jax.experimental.pallas import tpu as pltpu


def _choose_tile(feat_dim, queue_size, batch, *, vmem_budget_bytes=16 * 1024 * 1024):
    """Pick the queue-column tile width (multiple of 128, divides queue_size).

    Prefers the fewest tiles that fit the VMEM budget, but keeps >= 2 tiles so
    both v7x TensorCores get work when the grid axis is marked "parallel".
    """
    assert queue_size % 128 == 0, "queue_size must be a multiple of 128"
    # tn-dependent VMEM: double-buffered (D, tn) queue tile + two double-buffered
    # (B, tn) output tiles, all f32.
    bytes_per_col = 4 * (2 * feat_dim + 4 * batch)
    tn_cap = max(128, (vmem_budget_bytes // bytes_per_col) // 128 * 128)
    if queue_size <= 128:
        return queue_size, 1
    n_tiles = max(2, pl.cdiv(queue_size, tn_cap))
    while queue_size % (n_tiles * 128) != 0:
        n_tiles += 1
    return queue_size // n_tiles, n_tiles


def _make_fused_cos_theta_fn(batch, feat_dim, queue_size, *, scale, loss_type,
                             margin):
    """Build a pallas_call computing both scaled cos-theta matrices at once.

    Inputs : index (scalar prefetch), p_stack=(p1;p2) (2B,D),
             g_stack=(g2;g1) (2B,D), queue (D,Q) (raw, unsubstituted).
    Outputs: (output1, output2), each (B, Q) f32, already clamped, substituted,
             margin-applied and scaled — matching PyTorch compute_theta + *scale.
    """
    tn, n_tiles = _choose_tile(feat_dim, queue_size, batch)
    two_b = 2 * batch
    cos_m = math.cos(margin)
    sin_m = math.sin(margin)

    def kernel(idx_ref, p_ref, g_ref, q_ref, o1_ref, o2_ref):
        j = pl.program_id(0)
        idx = idx_ref[0]
        tile_lo = j * tn

        p = p_ref[...]                                     # (2B, D)
        cos = jnp.dot(p, q_ref[...], preferred_element_type=jnp.float32)
        cos = jnp.clip(cos, -1.0, 1.0)                     # (2B, tn)
        cos1 = cos[:batch]                                 # p1 @ queue tile
        cos2 = cos[batch:]                                 # p2 @ queue tile

        # Does this tile contain any of the substituted / ground-truth columns
        # [idx, idx + batch)?  Only that tile pays the patch + margin work.
        intersects = jnp.logical_and(idx < tile_lo + tn, idx + batch > tile_lo)

        @pl.when(jnp.logical_not(intersects))
        def _():
            o1_ref[...] = (cos1 * scale).astype(o1_ref.dtype)
            o2_ref[...] = (cos2 * scale).astype(o2_ref.dtype)

        @pl.when(intersects)
        def _():
            g = g_ref[...]                                 # (2B, D): [g2; g1]
            # Block-diagonal p.g^T:  p1@g2^T and p2@g1^T  ->  (B, B) each.
            dn = (((1,), (1,)), ((), ()))
            pg1 = jax.lax.dot_general(p[:batch], g[:batch], dn,
                                      preferred_element_type=jnp.float32)
            pg2 = jax.lax.dot_general(p[batch:], g[batch:], dn,
                                      preferred_element_type=jnp.float32)

            row = jax.lax.broadcasted_iota(jnp.int32, (batch, tn), 0)
            colg = jax.lax.broadcasted_iota(jnp.int32, (batch, tn), 1) + tile_lo
            gt_mask = colg == (idx + row)                  # GT column per row
            in_sub = jnp.logical_and(colg >= idx, colg < idx + batch)
            onehot = gt_mask.astype(jnp.float32)           # (B, tn)

            # Place p_i . g_b at column idx+b via a tiny one-hot matmul,
            # emulating queue[:, idx:idx+B] = g.T without touching HBM.
            patch1 = jnp.clip(jnp.dot(pg1, onehot,
                                      preferred_element_type=jnp.float32),
                              -1.0, 1.0)
            patch2 = jnp.clip(jnp.dot(pg2, onehot,
                                      preferred_element_type=jnp.float32),
                              -1.0, 1.0)

            c1 = jnp.where(in_sub, patch1, cos1)
            c2 = jnp.where(in_sub, patch2, cos2)

            if loss_type == "am_softmax":
                c1 = jnp.where(gt_mask, c1 - margin, c1)
                c2 = jnp.where(gt_mask, c2 - margin, c2)
            elif loss_type == "arc_softmax":
                s1 = jnp.sqrt(jnp.maximum(1.0 - c1 * c1, 0.0))
                s2 = jnp.sqrt(jnp.maximum(1.0 - c2 * c2, 0.0))
                c1 = jnp.where(gt_mask, c1 * cos_m - s1 * sin_m, c1)
                c2 = jnp.where(gt_mask, c2 * cos_m - s2 * sin_m, c2)
            # loss_type == "softmax": clamp + substitution only.

            o1_ref[...] = (c1 * scale).astype(o1_ref.dtype)
            o2_ref[...] = (c2 * scale).astype(o2_ref.dtype)

    call = pl.pallas_call(
        kernel,
        out_shape=(jax.ShapeDtypeStruct((batch, queue_size), jnp.float32),
                   jax.ShapeDtypeStruct((batch, queue_size), jnp.float32)),
        grid_spec=pltpu.PrefetchScalarGridSpec(
            num_scalar_prefetch=1,                 # queue write index (SMEM)
            grid=(n_tiles,),
            in_specs=[
                pl.BlockSpec((two_b, feat_dim), lambda j, idx: (0, 0)),   # p
                pl.BlockSpec((two_b, feat_dim), lambda j, idx: (0, 0)),   # g
                pl.BlockSpec((feat_dim, tn), lambda j, idx: (0, j)),      # queue
            ],
            out_specs=[
                pl.BlockSpec((batch, tn), lambda j, idx: (0, j)),
                pl.BlockSpec((batch, tn), lambda j, idx: (0, j)),
            ],
        ),
        compiler_params=pltpu.CompilerParams(
            dimension_semantics=("parallel",)),
        cost_estimate=pl.CostEstimate(
            flops=2 * two_b * feat_dim * queue_size,
            transcendentals=0,
            bytes_accessed=4 * (feat_dim * queue_size
                                + 2 * batch * queue_size
                                + 2 * two_b * feat_dim),
        ),
    )

    # TODO(synk): optionally cast p/g/queue to bf16 for the matmul (keeps f32
    # accumulation) to halve queue HBM traffic at production sizes — left f32
    # here to keep bit-level parity with the PyTorch reference.

    def fn(index, p_stack, g_stack, queue):
        idx = jnp.asarray([index], dtype=jnp.int32)
        return call(idx, p_stack, g_stack, queue)

    return fn


class SSTPrototype:
    """JAX/Pallas port of head/SST_Prototype.py."""

    def __init__(self, feat_dim=64, queue_size=256, scale=30.0,
                 loss_type="softmax", margin=0.0, seed=0):
        assert queue_size % 128 == 0, "queue_size must be a multiple of 128"
        self.feat_dim = feat_dim
        self.queue_size = queue_size
        self.scale = float(scale)
        self.loss_type = loss_type
        self.margin = float(margin)

        # queue init: uniform(-1,1) columns, L2-normalized along feat dim
        # (matches torch.rand(...).uniform_(-1,1).renorm_(...).mul_(...) then
        #  F.normalize(dim=0) — unit-norm random-direction columns).
        key = jax.random.PRNGKey(seed)
        q = jax.random.uniform(key, (feat_dim, queue_size), jnp.float32,
                               minval=-1.0, maxval=1.0)
        self.queue = q / jnp.linalg.norm(q, axis=0, keepdims=True)

        self.index = 0
        self.label_list = [-1] * queue_size
        # random.random() in the original; deterministic here.
        self._py_rng = random.Random(0)
        self._fn_cache = {}

    def _fused_fn(self, batch):
        if batch not in self._fn_cache:
            self._fn_cache[batch] = _make_fused_cos_theta_fn(
                batch, self.feat_dim, self.queue_size,
                scale=self.scale, loss_type=self.loss_type, margin=self.margin)
        return self._fn_cache[batch]

    def _update_queue(self, g, cur_ids, batch):
        # Single HBM queue write per forward (stateful buffer update).
        self.queue = jax.lax.dynamic_update_slice(self.queue, g.T,
                                                  (0, self.index))
        for i in range(batch):
            self.label_list[self.index + i] = int(cur_ids[i])
        self.index = (self.index + batch) % self.queue_size

    def get_id_set(self):
        return {lab for lab in self.label_list if lab != -1}

    def forward(self, p1, g2, p2, g1, cur_ids):
        batch = p1.shape[0]
        assert self.queue_size % batch == 0, \
            "queue_size must be a multiple of batch (as in the PyTorch module)"
        label = jnp.arange(batch, dtype=jnp.int32) + self.index

        g1 = jax.lax.stop_gradient(g1)
        g2 = jax.lax.stop_gradient(g2)

        # Fused kernel: output1 uses g2-substituted queue, output2 uses g1.
        p_stack = jnp.concatenate([p1, p2], axis=0)      # (2B, D)
        g_stack = jnp.concatenate([g2, g1], axis=0)      # (2B, D)
        output1, output2 = self._fused_fn(batch)(self.index, p_stack, g_stack,
                                                 self.queue)

        if self._py_rng.random() > 0.5:
            self._update_queue(g1, cur_ids, batch)
        else:
            self._update_queue(g2, cur_ids, batch)

        return output1, output2, label, self.get_id_set()


def _l2_normalize(x):
    return x / jnp.linalg.norm(x, axis=1, keepdims=True)


def _reference(p, g, queue, index, scale, loss_type, margin):
    """Pure-JAX reference mirroring the PyTorch compute_theta + *scale path."""
    batch = p.shape[0]
    qe = jax.lax.dynamic_update_slice(queue, g.T, (0, index))
    cos = jnp.clip(p @ qe, -1.0, 1.0)
    rows = jnp.arange(batch)
    label = rows + index
    if loss_type == "am_softmax":
        gt = cos[rows, label]
        cos = cos.at[rows, label].set(gt - margin)
    elif loss_type == "arc_softmax":
        gt = cos[rows, label]
        sin = jnp.sqrt(jnp.maximum(1.0 - gt * gt, 0.0))
        cos = cos.at[rows, label].set(gt * math.cos(margin) -
                                      sin * math.sin(margin))
    return cos * scale


if __name__ == "__main__":
    BATCH, FEAT_DIM, QUEUE_SIZE = 8, 64, 256

    key = jax.random.PRNGKey(0)
    k1, k2, k3, k4 = jax.random.split(key, 4)
    p1 = _l2_normalize(jax.random.normal(k1, (BATCH, FEAT_DIM), jnp.float32))
    g2 = _l2_normalize(jax.random.normal(k2, (BATCH, FEAT_DIM), jnp.float32))
    p2 = _l2_normalize(jax.random.normal(k3, (BATCH, FEAT_DIM), jnp.float32))
    g1 = _l2_normalize(jax.random.normal(k4, (BATCH, FEAT_DIM), jnp.float32))
    cur_ids = jnp.arange(100, 100 + BATCH, dtype=jnp.int32)

    # --- softmax head: two consecutive forwards (exercises index > 0 and
    #     the stateful queue update between them). ---
    head = SSTPrototype(FEAT_DIM, QUEUE_SIZE, 30.0, "softmax", 0.0, seed=0)
    for _ in range(2):
        q_before, idx_before = head.queue, head.index
        out1, out2, label, id_set = head.forward(p1, g2, p2, g1, cur_ids)
        jax.block_until_ready((out1, out2, label))
        ref1 = _reference(p1, g2, q_before, idx_before, 30.0, "softmax", 0.0)
        ref2 = _reference(p2, g1, q_before, idx_before, 30.0, "softmax", 0.0)
        assert out1.shape == (BATCH, QUEUE_SIZE)
        assert out2.shape == (BATCH, QUEUE_SIZE)
        assert jnp.allclose(out1, ref1, atol=3e-5, rtol=1e-4)
        assert jnp.allclose(out2, ref2, atol=3e-5, rtol=1e-4)
        assert label.tolist() == [idx_before + i for i in range(BATCH)]
    assert head.get_id_set() == set(range(100, 100 + BATCH))

    # --- am_softmax head at a non-zero index whose GT columns fall in the
    #     second column tile (exercises the pl.when-gated patch path). ---
    head_am = SSTPrototype(FEAT_DIM, QUEUE_SIZE, 30.0, "am_softmax", 0.35, seed=1)
    head_am.index = 136
    q_before, idx_before = head_am.queue, head_am.index
    out1, out2, label, _ = head_am.forward(p1, g2, p2, g1, cur_ids)
    jax.block_until_ready((out1, out2))
    ref1 = _reference(p1, g2, q_before, idx_before, 30.0, "am_softmax", 0.35)
    ref2 = _reference(p2, g1, q_before, idx_before, 30.0, "am_softmax", 0.35)
    assert jnp.allclose(out1, ref1, atol=3e-5, rtol=1e-4)
    assert jnp.allclose(out2, ref2, atol=3e-5, rtol=1e-4)
    assert label.tolist() == [idx_before + i for i in range(BATCH)]

    # --- arc_softmax head. ---
    head_arc = SSTPrototype(FEAT_DIM, QUEUE_SIZE, 30.0, "arc_softmax", 0.5, seed=2)
    head_arc.index = 64
    q_before, idx_before = head_arc.queue, head_arc.index
    out1, out2, label, _ = head_arc.forward(p1, g2, p2, g1, cur_ids)
    jax.block_until_ready((out1, out2))
    ref1 = _reference(p1, g2, q_before, idx_before, 30.0, "arc_softmax", 0.5)
    ref2 = _reference(p2, g1, q_before, idx_before, 30.0, "arc_softmax", 0.5)
    assert jnp.allclose(out1, ref1, atol=5e-5, rtol=1e-4)
    assert jnp.allclose(out2, ref2, atol=5e-5, rtol=1e-4)

    print("KERNEL_OK")
</pallas_src>

<mosaic_0001>
module attributes {stable_mosaic.version = 11 : i64} {
  func.func @kernel(%arg0: i32, %arg1: memref<1xi32, #tpu.memory_space<smem>>, %arg2: memref<16x64xf32, #tpu.memory_space<vmem>>, %arg3: memref<16x64xf32, #tpu.memory_space<vmem>>, %arg4: memref<64x128xf32, #tpu.memory_space<vmem>>, %arg5: memref<8x128xf32, #tpu.memory_space<vmem>>, %arg6: memref<8x128xf32, #tpu.memory_space<vmem>>) attributes {dimension_semantics = [#tpu.dimension_semantics<parallel>], iteration_bounds = array<i64: 2>, scalar_prefetch = 1 : i64, scratch_operands = 0 : i64, tpu.core_type = #tpu.core_type<tc>, window_params = [{pipeline_mode = #tpu.pipeline_mode<synchronous>, transform_indices = @transform_0, window_bounds = array<i64: 16, 64>}, {pipeline_mode = #tpu.pipeline_mode<synchronous>, transform_indices = @transform_1, window_bounds = array<i64: 16, 64>}, {transform_indices = @transform_2, window_bounds = array<i64: 64, 128>}, {transform_indices = @transform_3, window_bounds = array<i64: 8, 128>}, {transform_indices = @transform_4, window_bounds = array<i64: 8, 128>}]} {
    %c0 = arith.constant 0 : index
    %0 = memref.load %arg1[%c0] : memref<1xi32, #tpu.memory_space<smem>>
    %c128_i32 = arith.constant 128 : i32
    %1 = arith.muli %arg0, %c128_i32 : i32
    %c0_0 = arith.constant 0 : index
    %c0_1 = arith.constant 0 : index
    %2 = vector.load %arg2[%c0_0, %c0_1] : memref<16x64xf32, #tpu.memory_space<vmem>>, vector<16x64xf32>
    %c0_2 = arith.constant 0 : index
    %c0_3 = arith.constant 0 : index
    %3 = vector.load %arg4[%c0_2, %c0_3] : memref<64x128xf32, #tpu.memory_space<vmem>>, vector<64x128xf32>
    %cst = arith.constant dense<0.000000e+00> : vector<16x128xf32>
    %4 = tpu.matmul %2, %3, %cst {dimension_numbers = #tpu.dot_dimension_numbers<[1], [0], [0], [1], [0, 0, 1, 1], [], []>} : vector<16x64xf32>, vector<64x128xf32>, vector<16x128xf32> -> vector<16x128xf32>
    %cst_4 = arith.constant -1.000000e+00 : f32
    %cst_5 = arith.constant 1.000000e+00 : f32
    %5 = vector.broadcast %cst_4 : f32 to vector<16x128xf32>
    %6 = arith.maximumf %5, %4 : vector<16x128xf32>
    %7 = vector.broadcast %cst_5 : f32 to vector<16x128xf32>
    %8 = arith.minimumf %7, %6 : vector<16x128xf32>
    %9 = vector.extract_strided_slice %8 {offsets = [0, 0], sizes = [8, 128], strides = [1, 1]} : vector<16x128xf32> to vector<8x128xf32>
    %10 = vector.extract_strided_slice %8 {offsets = [8, 0], sizes = [8, 128], strides = [1, 1]} : vector<16x128xf32> to vector<8x128xf32>
    %c128_i32_6 = arith.constant 128 : i32
    %11 = arith.addi %1, %c128_i32_6 : i32
    %12 = arith.cmpi slt, %0, %11 : i32
    %c8_i32 = arith.constant 8 : i32
    %13 = arith.addi %0, %c8_i32 : i32
    %14 = arith.cmpi sgt, %13, %1 : i32
    %15 = arith.andi %12, %14 : i1
    %true = arith.constant true
    %16 = arith.xori %15, %true : i1
    %17 = arith.extui %16 : i1 to i32
    %c0_i32 = arith.constant 0 : i32
    %18 = arith.cmpi ne, %17, %c0_i32 : i32
    scf.if %18 {
      %cst_8 = arith.constant 3.000000e+01 : f32
      %21 = vector.broadcast %cst_8 : f32 to vector<8x128xf32>
      %22 = arith.mulf %9, %21 : vector<8x128xf32>
      %c0_9 = arith.constant 0 : index
      %c0_10 = arith.constant 0 : index
      %23 = vector.load %arg5[%c0_9, %c0_10] : memref<8x128xf32, #tpu.memory_space<vmem>>, vector<8x128xf32>
      tpu.vector_store %arg5[%c0_9, %c0_10], %22 {strides = array<i32>} : memref<8x128xf32, #tpu.memory_space<vmem>>, vector<8x128xf32>,
      %cst_11 = arith.constant 3.000000e+01 : f32
      %24 = vector.broadcast %cst_11 : f32 to vector<8x128xf32>
      %25 = arith.mulf %10, %24 : vector<8x128xf32>
      %c0_12 = arith.constant 0 : index
      %c0_13 = arith.constant 0 : index
      %26 = vector.load %arg6[%c0_12, %c0_13] : memref<8x128xf32, #tpu.memory_space<vmem>>, vector<8x128xf32>
      tpu.vector_store %arg6[%c0_12, %c0_13], %25 {strides = array<i32>} : memref<8x128xf32, #tpu.memory_space<vmem>>, vector<8x128xf32>,
    } else {
    }
    %19 = arith.extui %15 : i1 to i32
    %c0_i32_7 = arith.constant 0 : i32
    %20 = arith.cmpi ne, %19, %c0_i32_7 : i32
    scf.if %20 {
      %c0_8 = arith.constant 0 : index
      %c0_9 = arith.constant 0 : index
      %21 = vector.load %arg3[%c0_8, %c0_9] : memref<16x64xf32, #tpu.memory_space<vmem>>, vector<16x64xf32>
      %22 = vector.extract_strided_slice %2 {offsets = [0, 0], sizes = [8, 64], strides = [1, 1]} : vector<16x64xf32> to vector<8x64xf32>
      %23 = vector.extract_strided_slice %21 {offsets = [0, 0], sizes = [8, 64], strides = [1, 1]} : vector<16x64xf32> to vector<8x64xf32>
      %cst_10 = arith.constant dense<0.000000e+00> : vector<8x8xf32>
      %24 = tpu.matmul %22, %23, %cst_10 {dimension_numbers = #tpu.dot_dimension_numbers<[1], [1], [0], [0], [0, 0, 1, 0], [], []>} : vector<8x64xf32>, vector<8x64xf32>, vector<8x8xf32> -> vector<8x8xf32>
      %25 = vector.extract_strided_slice %2 {offsets = [8, 0], sizes = [8, 64], strides = [1, 1]} : vector<16x64xf32> to vector<8x64xf32>
      %26 = vector.extract_strided_slice %21 {offsets = [8, 0], sizes = [8, 64], strides = [1, 1]} : vector<16x64xf32> to vector<8x64xf32>
      %cst_11 = arith.constant dense<0.000000e+00> : vector<8x8xf32>
      %27 = tpu.matmul %25, %26, %cst_11 {dimension_numbers = #tpu.dot_dimension_numbers<[1], [1], [0], [0], [0, 0, 1, 0], [], []>} : vector<8x64xf32>, vector<8x64xf32>, vector<8x8xf32> -> vector<8x8xf32>
      %28 = tpu.iota {dimensions = array<i32: 0>} : vector<8x128xi32>
      %29 = tpu.iota {dimensions = array<i32: 1>} : vector<8x128xi32>
      %30 = vector.broadcast %1 : i32 to vector<8x128xi32>
      %31 = arith.addi %29, %30 : vector<8x128xi32>
      %32 = vector.broadcast %0 : i32 to vector<8x128xi32>
      %33 = arith.addi %32, %28 : vector<8x128xi32>
      %34 = arith.cmpi eq, %31, %33 : vector<8x128xi32>
      %35 = vector.broadcast %0 : i32 to vector<8x128xi32>
      %36 = arith.cmpi sge, %31, %35 : vector<8x128xi32>
      %c8_i32_12 = arith.constant 8 : i32
      %37 = arith.addi %0, %c8_i32_12 : i32
      %38 = vector.broadcast %37 : i32 to vector<8x128xi32>
      %39 = arith.cmpi slt, %31, %38 : vector<8x128xi32>
      %40 = arith.andi %36, %39 : vector<8x128xi1>
      %41 = arith.extui %34 : vector<8x128xi1> to vector<8x128xi32>
      %42 = arith.sitofp %41 : vector<8x128xi32> to vector<8x128xf32>
      %cst_13 = arith.constant dense<0.000000e+00> : vector<8x128xf32>
      %43 = tpu.matmul %24, %42, %cst_13 {dimension_numbers = #tpu.dot_dimension_numbers<[1], [0], [0], [1], [0, 0, 1, 1], [], []>} : vector<8x8xf32>, vector<8x128xf32>, vector<8x128xf32> -> vector<8x128xf32>
      %cst_14 = arith.constant -1.000000e+00 : f32
      %cst_15 = arith.constant 1.000000e+00 : f32
      %44 = vector.broadcast %cst_14 : f32 to vector<8x128xf32>
      %45 = arith.maximumf %44, %43 : vector<8x128xf32>
      %46 = vector.broadcast %cst_15 : f32 to vector<8x128xf32>
      %47 = arith.minimumf %46, %45 : vector<8x128xf32>
      %cst_16 = arith.constant dense<0.000000e+00> : vector<8x128xf32>
      %48 = tpu.matmul %27, %42, %cst_16 {dimension_numbers = #tpu.dot_dimension_numbers<[1], [0], [0], [1], [0, 0, 1, 1], [], []>} : vector<8x8xf32>, vector<8x128xf32>, vector<8x128xf32> -> vector<8x128xf32>
      %cst_17 = arith.constant -1.000000e+00 : f32
      %cst_18 = arith.constant 1.000000e+00 : f32
      %49 = vector.broadcast %cst_17 : f32 to vector<8x128xf32>
      %50 = arith.maximumf %49, %48 : vector<8x128xf32>
      %51 = vector.broadcast %cst_18 : f32 to vector<8x128xf32>
      %52 = arith.minimumf %51, %50 : vector<8x128xf32>
      %53 = arith.select %40, %47, %9 : vector<8x128xi1>, vector<8x128xf32>
      %54 = arith.select %40, %52, %10 : vector<8x128xi1>, vector<8x128xf32>
      %cst_19 = arith.constant 3.000000e+01 : f32
      %55 = vector.broadcast %cst_19 : f32 to vector<8x128xf32>
      %56 = arith.mulf %53, %55 : vector<8x128xf32>
      %c0_20 = arith.constant 0 : index
      %c0_21 = arith.constant 0 : index
      %57 = vector.load %arg5[%c0_20, %c0_21] : memref<8x128xf32, #tpu.memory_space<vmem>>, vector<8x128xf32>
      tpu.vector_store %arg5[%c0_20, %c0_21], %56 {strides = array<i32>} : memref<8x128xf32, #tpu.memory_space<vmem>>, vector<8x128xf32>,
      %cst_22 = arith.constant 3.000000e+01 : f32
      %58 = vector.broadcast %cst_22 : f32 to vector<8x128xf32>
      %59 = arith.mulf %54, %58 : vector<8x128xf32>
      %c0_23 = arith.constant 0 : index
      %c0_24 = arith.constant 0 : index
      %60 = vector.load %arg6[%c0_23, %c0_24] : memref<8x128xf32, #tpu.memory_space<vmem>>, vector<8x128xf32>
      tpu.vector_store %arg6[%c0_23, %c0_24], %59 {strides = array<i32>} : memref<8x128xf32, #tpu.memory_space<vmem>>, vector<8x128xf32>,
    } else {
    }
    return
  }
  func.func @transform_0(%arg0: i32, %arg1: memref<1xi32, #tpu.memory_space<smem>>) -> (i32, i32) {
    %c0_i32 = arith.constant 0 : i32
    %c0_i32_0 = arith.constant 0 : i32
    %c0_i32_1 = arith.constant 0 : i32
    return %c0_i32, %c0_i32_0 : i32, i32
  }
  func.func @transform_1(%arg0: i32, %arg1: memref<1xi32, #tpu.memory_space<smem>>) -> (i32, i32) {
    %c0_i32 = arith.constant 0 : i32
    %c0_i32_0 = arith.constant 0 : i32
    %c0_i32_1 = arith.constant 0 : i32
    return %c0_i32, %c0_i32_0 : i32, i32
  }
  func.func @transform_2(%arg0: i32, %arg1: memref<1xi32, #tpu.memory_space<smem>>) -> (i32, i32) {
    %c0_i32 = arith.constant 0 : i32
    %c0_i32_0 = arith.constant 0 : i32
    return %c0_i32, %arg0 : i32, i32
  }
  func.func @transform_3(%arg0: i32, %arg1: memref<1xi32, #tpu.memory_space<smem>>) -> (i32, i32) {
    %c0_i32 = arith.constant 0 : i32
    %c0_i32_0 = arith.constant 0 : i32
    return %c0_i32, %arg0 : i32, i32
  }
  func.func @transform_4(%arg0: i32, %arg1: memref<1xi32, #tpu.memory_space<smem>>) -> (i32, i32) {
    %c0_i32 = arith.constant 0 : i32
    %c0_i32_0 = arith.constant 0 : i32
    return %c0_i32, %arg0 : i32, i32
  }
}

</mosaic_0001>

<bundles_post_ra>
// kernel: tpu_custom_call.1
= control target key start
LH: loop header
LB: loop body
LE: loop exit
PB: predicated region body
PF: predicated region fallthrough
CT: control target
= control target key end

     0   :  { %s1584_s0 = inlined_call_operand.<no memory space> [shape: s32[1], index: 0, kind: input, shape index: {}]   ;;  %s1585_s1 = inlined_call_operand.hbm [shape: f32[16,64], index: 1, kind: input, shape index: {}]   ;;  %s1586_s2 = inlined_call_operand.hbm [shape: f32[16,64], index: 2, kind: input, shape index: {}]   ;;  %s1587_s3 = inlined_call_operand.hbm [shape: f32[64,256], index: 3, kind: input, shape index: {}]   ;;  %s1588_s4 = inlined_call_operand.hbm [shape: f32[8,256], index: 4, kind: output, shape index: {0}]   ;;  %s1589_s5 = inlined_call_operand.hbm [shape: f32[8,256], index: 5, kind: output, shape index: {1}]  }
   0x1   :  { %11 = sst [smem:[#allocation3]] %s1584_s0 }
   0x2   :  { %12 = vsyncpa [#allocation5], 0 }
   0x3   :  { %13 = vsyncpa [#allocation8], 0 }
   0x4   :  { %14 = vsyncpa [#allocation6], 0 }
   0x5   :  { %16 = vsyncpa [#allocation6 + $0x1], 0 }
   0x6   :  { %17 = vsyncpa [#allocation12], 0 }
   0x7   :  { %19 = vsyncpa [#allocation12 + $0x1], 0  ;;  %s1265_s20 = smov 0   ;;  %s1267_s21 = smov 0  }
   0x8   :  { %s1269_s22 = smov 0   ;;  %s1271_s23 = smov 0  }
   0x9 LB: > { %s1286_s0 = sadd.s32 4294967295, %s1219_s23   ;;  %s841_s24 = sadd.s32 4294967294, %s1219_s23   ;;  %s1219_s23 = sphi %s1271_s23, %s1619_s23   ;;  %s1215_s22 = sphi %s1269_s22, %s1618_s22   ;;  %s1211_s21 = sphi %s1267_s21, %s1617_s21   ;;  %s1207_s20 = sphi %s1265_s20, %s1616_s20  }
   0xa   : > { %s1290_s25 = sadd.s32 1, %s1219_s23   ;;  %s74_s26 = sadd.s32 1, %s1215_s22 }
   0xb   : > { %s71_s27 = ssub.s32 %s1219_s23, %s1290_s25  ;;  %p81_p0 = scmp.ne.s32.totalorder %s1215_s22, %s1211_s21 }
   0xc   : > { %p72_p1 = scmp.eq.s32.totalorder %s71_s27, 0  ;;  %p82_p2 = scmp.eq.s32.totalorder %s1219_s23, 0 }
   0xd   : > { %p87_p3 = scmp.ne.s32.totalorder %s1211_s21, %s1207_s20  ;;  %p1590_p4 = scmp.eq.s32.totalorder %s1286_s0, 0 }
   0xe   : > { %s1302_s28 = scalar_select %p72_p1, %s1215_s22, %s74_s26  }
   0xf   : > { %p1304_p5 = por %p82_p2, %p81_p0  ;;  %p1310_p6 = por %p1590_p4, %p87_p3 }
  0x10   : > { %p111_p7 = scmp.eq.s32.totalorder %s1286_s0, 1  ;;  %p117_p8 = scmp.eq.s32.totalorder %s841_s24, 1 }
  0x11   : > { %s1595_s29 = scalar_select %p1304_p5, 1, 0 }
  0x12   : > { %s1596_s30 = scalar_select %p1310_p6, 1, 0 }
  0x13   : > { %p842_p9 = scmp.ge.s32.totalorder %s1219_s23, 1  ;;  %p150_p10 = scmp.lt.s32.totalorder %s1219_s23, 3 }
  0x14   : > { %p1317_p11 = por %p111_p7, %p81_p0  ;;  %p1321_p12 = por %p117_p8, %p87_p3 }
  0x15   : > { %p1325_p13 = pnand %p842_p9, %p150_p10  ;;  %s1221_s9 = smov [#allocation4]  }
  0x16   : > { %s1597_s6 = scalar_select %p1317_p11, 1, 0 }
  0x17   : > { %s1598_s7 = scalar_select %p1321_p12, 1, 0 }
  0x18   : > { %s1599_s8 = scalar_select %p1325_p13, 1, 0 }
  0x19   : > { %p963_p1 = pneg %p1325_p13  ;;  %s162_s10 = sshll.u32 %s1221_s9, 4  ;;  %s163_s10 = int_to_ptr.vmem [resolvable:$true] %s162_s10 }
  0x1a   : > { %s1222_s12 = smov [#allocation7]   ;;  %s1027_s16 = scalar_lea.hbm %s1585_s1, 256 }
  0x1b   : > { %p1333_p2 = pnand %p963_p1, %p1590_p4  ;;  %s175_s13 = sshll.u32 %s1222_s12, 4  ;;  %s176_s13 = int_to_ptr.vmem [resolvable:$true] %s175_s13 }
  0x1c   : > { %p1028_p7 = scmp.ne.s32.totalorder %s1585_s1, %s1027_s16  ;;  %p1034_p1 = scmp.lt.u32.totalorder %s1027_s16, %s1585_s1 }
  0x1d   : > { %p1029_p8 = pneg %p1333_p2 }
  0x1f   : > { %p1030_p9 = pnand %p1029_p8, %p1028_p7 }
  0x21   : > { %p1031_p10 = pneg %p1030_p9 }
  0x23   : > { %p1036_p0 = pnand %p1034_p1, %p1031_p10 }
  0x25   : > { %1039 = shalt.err (!%p1036_p0)
}
  0x26   : > { %s1040_s26 = scalar_lea.vmem %s163_s10, 256  ;;  %p1048_p11 = scmp.lt.s32.totalorder %s163_s10, %s163_s10 }
  0x27   : > { %p1041_p4 = scmp.ne.s32.totalorder %s163_s10, %s1040_s26  ;;  %p1049_p6 = scmp.lt.s32.totalorder %s1040_s26, %s1040_s26 }
  0x29   : > { %p1043_p3 = pnand %p1041_p4, %p1029_p8  ;;  %p1050_p13 = por %p1049_p6, %p1048_p11 }
  0x2b   : > { %p1044_p12 = pneg %p1043_p3 }
  0x2d   : > { %p1051_p5 = pnand %p1050_p13, %p1044_p12 }
  0x2f   : > { %1054 = shalt.err (!%p1051_p5)
}
  0x30   : > { %s1223_s27 = smov 128   ;;  %s1224_s9 = smov 8  }
  0x31   : > { %966 = dma.hbm_to_vmem [thread:$0]  (!%p1333_p2), %s1585_s1, 256, %s163_s10, [#allocation5], %s1223_s27, %s1223_s27, %s1224_s9  }
  0x32   : > { %p1601_p4 = scmp.ne.s32.totalorder %s1595_s29, 0  ;;  %p1602_p0 = scmp.lt.s32.totalorder %s1219_s23, 2 }
  0x33   : > { %s1055_s18 = scalar_lea.hbm %s1586_s2, 256 }
  0x34   : > { %p1368_p3 = pnand %p1602_p0, %p1601_p4  ;;  %p1056_p5 = scmp.ne.s32.totalorder %s1586_s2, %s1055_s18 }
  0x35   : > { %p1062_p12 = scmp.lt.u32.totalorder %s1055_s18, %s1586_s2 }
  0x36   : > { %s1603_s15 = scalar_select %p1368_p3, 1, 0 }
  0x37   : > { %p1058_p6 = pnand %p1056_p5, %p1029_p8 }
  0x39   : > { %p1059_p11 = pneg %p1058_p6 }
  0x3b   : > { %p1064_p13 = pnand %p1062_p12, %p1059_p11 }
  0x3d   : > { %1067 = shalt.err (!%p1064_p13)
}
  0x3e   : > { %s1068_s26 = scalar_lea.vmem %s176_s13, 256  ;;  %p1076_p1 = scmp.lt.s32.totalorder %s176_s13, %s176_s13 }
  0x3f   : > { %p1069_p7 = scmp.ne.s32.totalorder %s176_s13, %s1068_s26  ;;  %p1077_p4 = scmp.lt.s32.totalorder %s1068_s26, %s1068_s26 }
  0x41   : > { %p1071_p9 = pnand %p1069_p7, %p1029_p8  ;;  %p1078_p0 = por %p1077_p4, %p1076_p1 }
  0x43   : > { %p1072_p10 = pneg %p1071_p9 }
  0x45   : > { %p1079_p3 = pnand %p1078_p0, %p1072_p10 }
  0x47   : > { %1082 = shalt.err (!%p1079_p3)
}
  0x48   : > { %969 = dma.hbm_to_vmem [thread:$0]  (!%p1333_p2), %s1586_s2, 256, %s176_s13, [#allocation8], %s1223_s27, %s1223_s27, %s1224_s9  }
  0x49   : > { %s189_s16 = sand.u32 1, %s1219_s23   ;;  %s191_s17 = sand.u32 1, %s1215_s22  }
  0x4a   : > { %s846_s18 = sshll.u32 %s191_s17, 6  ;;  %s847_s19 = sshll.u32 %s1219_s23, 7 }
  0x4b   : > { %s1401_s11 = scalar_lea.hbm %s1587_s3, %s847_s19  ;;  %s193_s29 = scalar_lea.vmem [#allocation9], %s846_s18 }
  0x4c   : > { %s199_s26 = sshll.u32 %s193_s29, 4  ;;  %s1405_s12 = scalar_lea.sflag [#allocation5], %s189_s16  ;;  %s1403_s26 = int_to_ptr.vmem [resolvable:$true] %s199_s26 }
  0x4d   : > { %s1083_s13 = scalar_lea.hbm %s1401_s11, 1024  ;;  %p1604_p8 = scmp.ne.s32.totalorder %s1603_s15, 0 }
  0x4e   : > { %p1084_p2 = scmp.ne.s32.totalorder %s1401_s11, %s1083_s13  ;;  %s1088_s19 = scalar_lea.hbm %s1587_s3, 2048 }
  0x4f   : > { %p1085_p3 = pneg %p1604_p8  ;;  %p1089_p11 = scmp.lt.u32.totalorder %s1401_s11, %s1587_s3 }
  0x50   : > { %p1090_p12 = scmp.lt.u32.totalorder %s1088_s19, %s1083_s13  ;;  %p1092_p7 = scmp.lt.u32.totalorder %s1083_s13, %s1401_s11 }
  0x51   : > { %p1086_p5 = pnand %p1085_p3, %p1084_p2 }
  0x52   : > { %p1091_p13 = por %p1090_p12, %p1089_p11 }
  0x53   : > { %p1087_p6 = pneg %p1086_p5 }
  0x54   : > { %p1093_p9 = por %p1092_p7, %p1091_p13 }
  0x56   : > { %p1094_p10 = pnand %p1093_p9, %p1087_p6 }
  0x58   : > { %1097 = shalt.err (!%p1094_p10)
}
  0x59   : > { %s1098_s16 = scalar_lea.vmem %s1403_s26, 1024  ;;  %s1225_s18 = smov [#allocation9]  }
  0x5a   : > { %p1099_p1 = scmp.ne.s32.totalorder %s1403_s26, %s1098_s16  ;;  %s1103_s29 = sshll.u32 %s1225_s18, 4  ;;  %s1104_s29 = int_to_ptr.vmem [resolvable:$false] %s1103_s29 }
  0x5b   : > { %s1105_s14 = scalar_lea.vmem %s1104_s29, 2048  ;;  %p1106_p2 = scmp.lt.s32.totalorder %s1403_s26, %s1104_s29 }
  0x5c   : > { %p1101_p4 = pnand %p1099_p1, %p1085_p3  ;;  %p1107_p5 = scmp.lt.s32.totalorder %s1105_s14, %s1098_s16 }
  0x5e   : > { %p1102_p0 = pneg %p1101_p4  ;;  %p1108_p11 = por %p1107_p5, %p1106_p2 }
  0x60   : > { %p1109_p12 = pnand %p1108_p11, %p1102_p0 }
  0x62   : > { %1112 = shalt.err (!%p1109_p12)
}
  0x63   : > { %s1226_s13 = smov 256   ;;  %p1605_p3 = scmp.ne.s32.totalorder %s1599_s8, 0 }
  0x64   : > { %973 = dma.hbm_to_vmem [thread:$0]  (!%p1604_p8), %s1401_s11, 1024, %s1403_s26, %s1405_s12, %s1226_s13, %s1223_s27, %s1224_s9  }
  0x65   : > { %211 = sbr.rel (%p1605_p3) target bundleno = 833 (0x341), region = 32  ;;  %p1606_p6 = scmp.eq.s32.totalorder (!%p1605_p3), %s1286_s0, 0 }
  0x6c   : > { %1186 = dma.done.wait (%p1606_p6), [#allocation5], 256   ;;  %p1607_p13 = pmov %p1606_p6 }
  0x6d   : > { %p1608_p7 = pmov %p1606_p6 }
  0x6e   : > { %1188 = vsyncadd (%p1607_p13), [#allocation5], 4294967040 }
  0x6f   : > { %1190 = dma.done.wait (%p1608_p7), [#allocation8], 256   ;;  %p1609_p9 = pmov %p1606_p6 }
  0x70   : > { %s221_s15 = sand.u32 1, %s1286_s0   ;;  %s1447_s27 = sand.u32 1, %s1211_s21  }
  0x71   : > { %1192 = vsyncadd (%p1609_p9), [#allocation8], 4294967040  ;;  %s851_s8 = sshll.u32 %s1447_s27, 6  ;;  %s222_s9 = scalar_lea.sflag [#allocation5], %s221_s15 }
  0x72   : > { %s225_s11 = scalar_lea.vmem [#allocation9], %s851_s8  ;;  %p1610_p8 = scmp.ne.s32.totalorder %s1596_s30, 0 }
  0x74   : > { %1194 = dma.done.wait (%p1610_p8), %s222_s9, 1024  }
  0x75   : > { %1196 = vsyncadd (%p1610_p8), %s222_s9, 4294966272  ;;  %s852_s26 = sshll.u32 %s1447_s27, 3  ;;  %s1455_s12 = sld [smem:[#allocation3]]  ;;  %v259_v0 = vld [vmem:[%s225_s11] sm:$0xff]  ;;  %v260_v1 = vld [vmem:[%s225_s11 + $0x8] sm:$0xff]  ;;  %vm267_vm0 = vcmask 523264  }
  0x76   : > { %s1458_s17 = sshll.u32 %s1286_s0, 7  ;;  %v261_v2 = vld [vmem:[%s225_s11 + $0x10] sm:$0xff]  ;;  %v933_v3 = vpack.c.bf16 %v260_v1, %v259_v0  ;;  %v262_v4 = vld [vmem:[%s225_s11 + $0x18] sm:$0xff]  ;;  %v263_v6 = vld [vmem:[%s225_s11 + $0x20] sm:$0xff]  ;;  %s1482_s0 = scalar_lea.vmem [#allocation10], %s852_s26 }
  0x77   : > { %s353_s19 = sadd.s32 128, %s1458_s17  ;;  %v937_v5 = vpack.c.bf16 %v262_v4, %v261_v2  ;;  %v264_v7 = vld [vmem:[%s225_s11 + $0x28] sm:$0xff]  ;;  %v257_v8 = vld [vmem:[#allocation4] sm:$0xff]  ;;  %v265_v10 = vld [vmem:[%s225_s11 + $0x30] sm:$0xff]  ;;  %s1486_s16 = scalar_lea.vmem [#allocation11], %s852_s26 }
  0x78   : > { %934 = vmatprep.subr.bf16.mxu0 %v933_v3  ;;  %910 = vmatprep.mubr.msk.f32.mxu0 %vm267_vm0, %v257_v8  ;;  %v941_v9 = vpack.c.bf16 %v264_v7, %v263_v6  ;;  %v266_v11 = vld [vmem:[%s225_s11 + $0x38] sm:$0xff]  ;;  %v258_v13 = vld [vmem:[#allocation4 + $0x8] sm:$0xff] }
  0x79   : > { %936 = vmatpush3.bf16.msra.mxu0 %v933_v3  ;;  %v945_v12 = vpack.c.bf16 %v266_v11, %v265_v10 }
  0x7a   : > { %938 = vmatprep.subr.bf16.mxu0 %v937_v5 }
  0x7b   : > { %p1462_p10 = scmp.lt.s32.totalorder %s1455_s12, %s353_s19  ;;  %s355_s30 = sadd.s32 8, %s1455_s12 }
  0x7c   : > { %p1470_p1 = scmp.gt.s32.totalorder %s355_s30, %s1458_s17 }
  0x7d   : > { %940 = vmatpush3.bf16.msra.mxu0 %v937_v5 }
  0x7e   : > { %p357_p4 = pnand %p1470_p1, %p1462_p10  ;;  %942 = vmatprep.subr.bf16.mxu0 %v941_v9 }
  0x7f   : > { %v361_v18 = vld [vmem:[#allocation7] sm:$0xff] (!%p357_p4)  ;;  %v362_v19 = vld [vmem:[#allocation7 + $0x8] sm:$0xff] (!%p357_p4)  ;;  %v509_v20 = vlaneseq (!%p357_p4)  ;;  %v1227_v21 = vmov (!%p357_p4), 0.0   ;;  %v513_v22 = vstv (!%p357_p4), %s1458_s17  ;;  %v515_v23 = vstv (!%p357_p4), %s1455_s12 }
  0x80   : > { %918 = vmatprep.subr.mxu1 (!%p357_p4), %v1227_v21  ;;  %vm1228_vm1 = vmmov (!%p357_p4), 0   ;;  %v1229_v28 = vmov (!%p357_p4), 1.0   ;;  %vm524_vm3 = vcmask (!%p357_p4), 64512   ;;  %v519_v33 = vstv (!%p357_p4), %s355_s30 }
  0x81   : > { %944 = vmatpush3.bf16.msra.mxu0 %v941_v9  ;;  %919 = vmatpush3.xpose.msk.msra.mxu1 (!%p357_p4), %vm267_vm0, %v362_v19  ;;  %v510_v24 = vshrl.u32 (!%p357_p4), %v509_v20, 7  ;;  %v512_v25 = vand.u32 (!%p357_p4), 127, %v509_v20 }
  0x82   : > { %946 = vmatprep.subr.bf16.mxu0 %v945_v12  ;;  %920 = vmatprep.mubr.msk.f32.mxu1 (!%p357_p4), %vm1228_vm1, %v1227_v21 }
  0x83   : > { %928 = vmatprep.subr.mxu1 (!%p357_p4), %v1227_v21  ;;  %v514_v26 = vadd.s32 (!%p357_p4), %v513_v22, %v512_v25  ;;  %v516_v27 = vadd.s32 (!%p357_p4), %v515_v23, %v510_v24 }
  0x84   : > { %921 = vmatmul.mubr.msk.f32.vlgmr.msra.gmra.mrb[0].mxu1 (!%p357_p4), %vm267_vm0, %v258_v13 }
  0x85   : > { %948 = vmatpush3.bf16.msra.mxu0 %v945_v12  ;;  %vm517_vm2 = vcmp.eq.s32.totalorder (!%p357_p4), %v514_v26, %v516_v27  ;;  %930 = vmatprep.mubr.msk.f32.mxu1 (!%p357_p4), %vm1228_vm1, %v1227_v21  ;;  %vm518_vm4 = vcmp.ge.s32.totalorder (!%p357_p4), %v514_v26, %v515_v23  ;;  %vm520_vm5 = vcmp.lt.s32.totalorder (!%p357_p4), %v514_v26, %v519_v33 }
  0x86   : > { %913 = vmatprep.subr.mxu0 (!%p357_p4), %v1227_v21  ;;  %929 = vmatpush3.msk.msra.mxu1 (!%p357_p4), %vm517_vm2, %v1229_v28  ;;  %vm521_vm6 = vmand (!%p357_p4), %vm518_vm4, %vm520_vm5 }
  0x88   : > { %911 = vmatmul.mubr.msk.f32.vlgmr.msra.gmra.mrb[0].mxu0 %vm267_vm0, %v258_v13 }
  0x89   : > { %915 = vmatprep.mubr.msk.f32.mxu0 (!%p357_p4), %vm1228_vm1, %v1227_v21 }
  0x8e   : > { %914 = vmatpush3.xpose.msk.msra.mxu0 (!%p357_p4), %vm267_vm0, %v361_v18 }
  0x8f   : > { %923 = vmatprep.subr.mxu0 (!%p357_p4), %v1227_v21 }
 0x157   : > { %360 = sbr.rel (%p357_p4) target bundleno = 778 (0x30a), region = 48  ;;  %v505_v30 = vpop.f32.mrb[0].mxu1 (!%p357_p4) }
 0x158   : > { %v922_v32 = vpop.f32.mrb[1].mxu1 (!%p357_p4)  ;;  %931 = vmatmul.mubr.msk.f32.vlgmr.msra.gmra.mrb[2].mxu1 (!%p357_p4), %vm524_vm3, %v505_v30 }
 0x15b   : > { %v912_v14 = vpop.f32.mrb[0].mxu0 }
 0x15c   : > { %v858_v15 = vclamps-f32 %v912_v14, 1.0  ;;  %v340_v16 = vpop.f32.mrb[1].mxu0  ;;  %916 = vmatmul.mubr.msk.f32.vlgmr.msra.gmra.mrb[0].mxu0 (!%p357_p4), %vm267_vm0, %v257_v8 }
 0x15d   : > { %v857_v17 = vclamps-f32 %v340_v16, 1.0  ;;  %925 = vmatprep.mubr.msk.f32.mxu0 (!%p357_p4), %vm1228_vm1, %v1227_v21  ;;  %924 = vmatpush3.msk.msra.mxu0 (!%p357_p4), %vm517_vm2, %v1229_v28 }
 0x22b   : > { %v669_v35 = vpop.f32.mrb[2].mxu1 }
 0x22c   : > { %v869_v37 = vclamps-f32 %v669_v35, 1.0  ;;  %v932_v39 = vpop.f32.mrb[3].mxu1 }
 0x22e   : > { %v676_v41 = vsel %vm521_vm6, %v869_v37, %v858_v15 }
 0x22f   : > { %v432_v29 = vpop.f32.mrb[0].mxu0  ;;  %v679_v43 = vmul.f32 30.0, %v676_v41 }
 0x230   : > { %v917_v31 = vpop.f32.mrb[1].mxu0  ;;  %926 = vmatmul.mubr.msk.f32.vlgmr.msra.gmra.mrb[2].mxu0 %vm524_vm3, %v432_v29 }
 0x231   : > { %680 = vst [vmem:[%s1486_s16] sm:$0xff] %v679_v43 }
 0x303   : > { %v594_v34 = vpop.f32.mrb[2].mxu0 }
 0x304   : > { %v866_v36 = vclamps-f32 %v594_v34, 1.0  ;;  %v927_v38 = vpop.f32.mrb[3].mxu0 }
 0x306   : > { %v675_v40 = vsel %vm521_vm6, %v866_v36, %v857_v17 }
 0x307   : > { %v677_v42 = vmul.f32 30.0, %v675_v40 }
 0x309   : > { %678 = vst [vmem:[%s1482_s0] sm:$0xff] %v677_v42 }
 0x30a PF: > { %683 = sbr.rel (!%p357_p4) target bundleno = 785 (0x311), region = 52  ;;  %v684_v44 = vmul.f32 (%p357_p4), 30.0, %v857_v17  ;;  %v686_v45 = vmul.f32 (%p357_p4), 30.0, %v858_v15 }
 0x30c   : > { %685 = vst [vmem:[%s1482_s0] sm:$0xff] (%p357_p4), %v684_v44  ;;  %687 = vst [vmem:[%s1486_s16] sm:$0xff] (%p357_p4), %v686_v45 }
 0x311 PF: > { %s1514_s14 = scalar_lea.hbm %s1588_s4, %s1458_s17  ;;  %s707_s13 = sshll.u32 %s1482_s0, 4  ;;  %s1517_s13 = int_to_ptr.vmem [resolvable:$true] %s707_s13 }
 0x312   : > { %s1523_s9 = scalar_lea.hbm %s1589_s5, %s1458_s17  ;;  %s689_s11 = scalar_lea.sflag [#allocation6], %s1447_s27 }
 0x313   : > { %s1113_s26 = scalar_lea.vmem %s1517_s13, 128  ;;  %p1613_p2 = scmp.ne.s32.totalorder %s1597_s6, 0 }
 0x314   : > { %p1114_p0 = scmp.ne.s32.totalorder %s1517_s13, %s1113_s26  ;;  %s1230_s12 = smov [#allocation10]  }
 0x315   : > { %s1117_s19 = sshll.u32 %s1230_s12, 4  ;;  %s1118_s19 = int_to_ptr.vmem [resolvable:$false] %s1117_s19 }
 0x316   : > { %p1115_p5 = pnand %p1114_p0, %p1613_p2  ;;  %s1119_s24 = scalar_lea.vmem %s1118_s19, 256 }
 0x317   : > { %p1120_p12 = scmp.lt.s32.totalorder %s1517_s13, %s1118_s19  ;;  %p1121_p3 = scmp.lt.s32.totalorder %s1119_s24, %s1113_s26 }
 0x318   : > { %p1116_p11 = pneg %p1115_p5 }
 0x319   : > { %p1122_p6 = por %p1121_p3, %p1120_p12 }
 0x31b   : > { %p1123_p13 = pnand %p1122_p6, %p1116_p11 }
 0x31d   : > { %1126 = shalt.err (!%p1123_p13)
}
 0x31e   : > { %s1127_s17 = scalar_lea.hbm %s1514_s14, 128  ;;  %s1131_s0 = scalar_lea.hbm %s1588_s4, 256 }
 0x31f   : > { %p1128_p7 = scmp.ne.s32.totalorder %s1514_s14, %s1127_s17  ;;  %p1132_p10 = scmp.lt.u32.totalorder %s1514_s14, %s1588_s4 }
 0x320   : > { %p1133_p1 = scmp.lt.u32.totalorder %s1131_s0, %s1127_s17  ;;  %p1135_p0 = scmp.lt.u32.totalorder %s1127_s17, %s1514_s14 }
 0x321   : > { %p1129_p9 = pnand %p1128_p7, %p1613_p2 }
 0x322   : > { %p1134_p4 = por %p1133_p1, %p1132_p10 }
 0x323   : > { %p1130_p8 = pneg %p1129_p9 }
 0x324   : > { %p1136_p5 = por %p1135_p0, %p1134_p4 }
 0x326   : > { %p1137_p11 = pnand %p1136_p5, %p1130_p8 }
 0x328   : > { %1140 = shalt.err (!%p1137_p11)
}
 0x329   : > { %959 = dma.vmem_to_hbm [thread:$0]  (%p1613_p2), %s1517_s13, 128, %s1514_s14, %s689_s11  }
 0x32a   : > { %s720_s15 = sshll.u32 %s1486_s16, 4  ;;  %s694_s8 = scalar_lea.sflag [#allocation12], %s1447_s27  ;;  %s721_s15 = int_to_ptr.vmem [resolvable:$true] %s720_s15 }
 0x32b   : > { %s1141_s26 = scalar_lea.vmem %s721_s15, 128  ;;  %s1231_s12 = smov [#allocation11]  }
 0x32c   : > { %p1142_p12 = scmp.ne.s32.totalorder %s721_s15, %s1141_s26  ;;  %s1145_s19 = sshll.u32 %s1231_s12, 4  ;;  %s1146_s19 = int_to_ptr.vmem [resolvable:$false] %s1145_s19 }
 0x32d   : > { %s1147_s24 = scalar_lea.vmem %s1146_s19, 256  ;;  %p1148_p13 = scmp.lt.s32.totalorder %s721_s15, %s1146_s19 }
 0x32e   : > { %p1143_p3 = pnand %p1142_p12, %p1613_p2  ;;  %p1149_p7 = scmp.lt.s32.totalorder %s1147_s24, %s1141_s26 }
 0x330   : > { %p1144_p6 = pneg %p1143_p3  ;;  %p1150_p9 = por %p1149_p7, %p1148_p13 }
 0x332   : > { %p1151_p8 = pnand %p1150_p9, %p1144_p6 }
 0x334   : > { %1154 = shalt.err (!%p1151_p8)
}
 0x335   : > { %s1155_s27 = scalar_lea.hbm %s1523_s9, 128  ;;  %s1159_s13 = scalar_lea.hbm %s1589_s5, 256 }
 0x336   : > { %p1156_p10 = scmp.ne.s32.totalorder %s1523_s9, %s1155_s27  ;;  %p1160_p0 = scmp.lt.u32.totalorder %s1523_s9, %s1589_s5 }
 0x337   : > { %p1161_p5 = scmp.lt.u32.totalorder %s1159_s13, %s1155_s27  ;;  %p1163_p12 = scmp.lt.u32.totalorder %s1155_s27, %s1523_s9 }
 0x338   : > { %p1157_p1 = pnand %p1156_p10, %p1613_p2 }
 0x339   : > { %p1162_p11 = por %p1161_p5, %p1160_p0 }
 0x33a   : > { %p1158_p4 = pneg %p1157_p1 }
 0x33b   : > { %p1164_p3 = por %p1163_p12, %p1162_p11 }
 0x33d   : > { %p1165_p6 = pnand %p1164_p3, %p1158_p4 }
 0x33f   : > { %1168 = shalt.err (!%p1165_p6)
}
 0x340   : > { %960 = dma.vmem_to_hbm [thread:$0]  (%p1613_p2), %s721_s15, 128, %s1523_s9, %s694_s8  }
 0x341 PF: > { %s732_s30 = sand.u32 1, %s1207_s20   ;;  %p1614_p13 = scmp.ne.s32.totalorder %s1598_s7, 0 }
 0x342   : > { %p1615_p7 = scmp.ge.s32.totalorder %s1219_s23, 2  ;;  %s733_s10 = scalar_lea.sflag [#allocation6], %s732_s30 }
 0x344   : > { %p975_p9 = pnand %p1615_p7, %p1614_p13 }
 0x346   : > { %1198 = dma.done.wait (!%p975_p9), %s733_s10, 128  }
 0x347   : > { %1200 = vsyncadd (!%p975_p9), %s733_s10, 4294967168  ;;  %s742_s0 = scalar_lea.sflag [#allocation12], %s732_s30 }
 0x348   : > { %1202 = dma.done.wait (!%p975_p9), %s742_s0, 128  }
 0x349   : > { %1204 = vsyncadd (!%p975_p9), %s742_s0, 4294967168  ;;  %p22_p2 = scmp.ge.s32.totalorder %s1290_s25, 4   ;;  %s1616_s20 = smov %s1211_s21 }
 0x34a   : > { %s1617_s21 = smov %s1215_s22  ;;  %s1618_s22 = smov %s1302_s28 }
 0x34b   : > { %s1619_s23 = smov %s1290_s25  ;;  %24 = sbr.rel (!%p22_p2) target bundleno = 9 (0x9), region = 109 }
 0x352   :  { %747 = vsyncpa [#allocation5], 1 }
 0x353   :  { %749 = vsyncpa [#allocation5 + $0x1], 1 }
 0x354   :  { %750 = vsyncpa [#allocation8], 1 }
 0x355   :  { %751 = vsyncpa [#allocation6], 1 }
 0x356   :  { %753 = vsyncpa [#allocation6 + $0x1], 1 }
 0x357   :  { %754 = vsyncpa [#allocation12], 1 }
 0x358   :  { %756 = vsyncpa [#allocation12 + $0x1], 1 }

</bundles_post_ra>
